<compile_context>
chip_gen: v7x
topology: tpu7x:2x2x1
jax: 0.10.0
libtpu: 0.0.40
codegen_flags: <defaults>
</compile_context>

<pallas_src>
import jax
import jax.numpy as jnp
from jax.experimental import pallas as pl
from jax.experimental.pallas import tpu as pltpu


def _meta_net_kernel(x_ref, w1_ref, b1_ref, w2_ref, b2_ref, o_ref):
    # x_ref:  (b_blk, C_in, t)   -- lanes = spatial pixels
    # w1_ref: (C_in, C_in)       -- PyTorch Conv2d (out, in) order
    # b1_ref: (C_in, 1)  f32
    # w2_ref: (C_out, C_in)
    # b2_ref: (C_out, 1) f32
    # o_ref:  (b_blk, C_out, t)
    nb, c_in, _ = x_ref.shape
    c_out = o_ref.shape[1]
    x = x_ref[...]

    # Broadcast the tiny weights over the batch block so the contraction is a
    # plain batched matmul (supported dot_general form on TPU).
    w1b = jnp.broadcast_to(w1_ref[...], (nb, c_in, c_in))
    w2b = jnp.broadcast_to(w2_ref[...], (nb, c_out, c_in))

    # First 1x1 conv: channel contraction, f32 accumulation.
    h = jnp.einsum('boi,bil->bol', w1b, x, preferred_element_type=jnp.float32)
    h = jnp.maximum(h + b1_ref[...], 0.0)          # bias + ReLU in f32
    # Second 1x1 conv (no activation cast: weights promote, DMA is the
    # bottleneck anyway).
    y = jnp.einsum('boi,bil->bol', w2b, h, preferred_element_type=jnp.float32)
    y = y + b2_ref[...]
    o_ref[...] = y.astype(o_ref.dtype)


def _pick_tiles(B, HW, per_lane_bytes, target_step_bytes):
    """Choose (b_blk, t_hw) so the double-buffered x+out bytes per grid step
    land near target_step_bytes, while keeping >=2 grid steps when B >= 2
    (megacore) and keeping every block a legal TPU tile."""
    budget_lanes = max(128, int(target_step_bytes) // (2 * per_lane_bytes))
    if HW <= budget_lanes:
        # Small spatial axis: take it whole (full-dim block is always legal)
        # and spend the remaining budget on batch images per step.
        t = HW
        b_cap = budget_lanes // HW
        if B >= 2:
            b_cap = min(b_cap, B // 2)   # keep >= 2 parallel grid steps
        b_blk = max(1, min(B, b_cap))
        while B % b_blk:                 # exact divisor -> no ragged batch
            b_blk -= 1
    else:
        # Large spatial axis: one image per step, big multiple-of-128 tile.
        b_blk = 1
        t = (budget_lanes // 128) * 128
        if HW % 128 == 0:
            # Prefer an exact divisor of HW: unmasked full-lane stores.
            cand = t
            while HW % cand:
                cand -= 128
            t = cand
        # else: HW not a multiple of 128 -> cdiv grid with a masked trailing
        # block (per-lane-independent compute, so this stays correct) instead
        # of the old whole-HW fallback that could blow scoped VMEM.
    return b_blk, t


def meta_net_pallas(x_nchw, w1, b1, w2, b2, *, out_dtype=None,
                    target_step_bytes=16 * 1024 * 1024):
    """x_nchw: (B, C_in, H, W); w1: (C_in, C_in); b1: (C_in,);
    w2: (C_out, C_in); b2: (C_out,).  Weights in PyTorch (out, in) order.
    Returns (B, C_out, H, W) in x's dtype (or `out_dtype` if given)."""
    B, C_in, H, W = x_nchw.shape
    C_out = w2.shape[0]
    HW = H * W

    # NCHW -> (B, C_in, H*W): contiguous reshape, no data movement, no cast.
    x = x_nchw.reshape(B, C_in, HW)
    out_dtype = x_nchw.dtype if out_dtype is None else out_dtype

    # Biases stay f32 so the bias+ReLU epilogue runs on the f32 accumulator.
    b1_col = b1.reshape(C_in, 1).astype(jnp.float32)
    b2_col = b2.reshape(C_out, 1).astype(jnp.float32)

    in_dsize = jnp.dtype(x.dtype).itemsize
    out_dsize = jnp.dtype(out_dtype).itemsize
    per_lane_bytes = C_in * in_dsize + C_out * out_dsize

    b_blk, t = _pick_tiles(B, HW, per_lane_bytes, target_step_bytes)
    grid = (pl.cdiv(B, b_blk), pl.cdiv(HW, t))

    weight_bytes = (w1.size * w1.dtype.itemsize + w2.size * w2.dtype.itemsize
                    + b1_col.size * 4 + b2_col.size * 4)
    cost = pl.CostEstimate(
        flops=2 * (C_in * C_in + C_out * C_in) * B * HW,
        transcendentals=0,
        bytes_accessed=B * HW * per_lane_bytes + weight_bytes,
    )

    out = pl.pallas_call(
        _meta_net_kernel,
        out_shape=jax.ShapeDtypeStruct((B, C_out, HW), out_dtype),
        grid_spec=pltpu.PrefetchScalarGridSpec(
            num_scalar_prefetch=0,
            grid=grid,
            in_specs=[
                pl.BlockSpec((b_blk, C_in, t), lambda b, j: (b, 0, j)),  # x
                pl.BlockSpec((C_in, C_in), lambda b, j: (0, 0)),         # W1
                pl.BlockSpec((C_in, 1), lambda b, j: (0, 0)),            # b1
                pl.BlockSpec((C_out, C_in), lambda b, j: (0, 0)),        # W2
                pl.BlockSpec((C_out, 1), lambda b, j: (0, 0)),           # b2
            ],
            out_specs=pl.BlockSpec((b_blk, C_out, t), lambda b, j: (b, 0, j)),
        ),
        compiler_params=pltpu.CompilerParams(
            dimension_semantics=("parallel", "parallel"),
            vmem_limit_bytes=48 * 1024 * 1024),
        cost_estimate=cost,
    )(x, w1, b1_col, w2, b2_col)

    # (B, C_out, H*W) -> (B, C_out, H, W): contiguous reshape, free.
    return out.reshape(B, C_out, H, W)


def _reference(x_nchw, w1, b1, w2, b2):
    # 1x1 conv == channel matmul with PyTorch (out, in) weights.
    h = jnp.einsum('oi,bihw->bohw', w1, x_nchw) + b1[None, :, None, None]
    h = jnp.maximum(h, 0.0)
    y = jnp.einsum('oi,bihw->bohw', w2, h) + b2[None, :, None, None]
    return y


if __name__ == "__main__":
    key = jax.random.PRNGKey(0)
    B, in_ch, out_ch, Hh, Ww = 2, 4, 8, 16, 16

    k_x, k_w1, k_b1, k_w2, k_b2 = jax.random.split(key, 5)
    x = jax.random.normal(k_x, (B, in_ch, Hh, Ww), dtype=jnp.float32)

    # Conv2d 1x1 weights in PyTorch (out_ch, in_ch) order.
    w1 = jax.random.normal(k_w1, (in_ch, in_ch), dtype=jnp.float32) * 0.1
    b1 = jax.random.normal(k_b1, (in_ch,), dtype=jnp.float32) * 0.1
    w2 = jax.random.normal(k_w2, (out_ch, in_ch), dtype=jnp.float32) * 0.1
    b2 = jax.random.normal(k_b2, (out_ch,), dtype=jnp.float32) * 0.1

    y_ref = jax.block_until_ready(_reference(x, w1, b1, w2, b2))

    # f32 path: exact, tight tolerance.
    y = jax.block_until_ready(meta_net_pallas(x, w1, b1, w2, b2))
    assert y.shape == (B, out_ch, Hh, Ww), y.shape
    assert y.dtype == x.dtype
    assert jnp.allclose(y, y_ref, atol=1e-5, rtol=1e-5), "f32 mismatch"

    # f32-in / bf16-out path (no wrapper-side cast pass; ~33% less HBM traffic).
    y_bf16 = jax.block_until_ready(
        meta_net_pallas(x, w1, b1, w2, b2, out_dtype=jnp.bfloat16))
    assert y_bf16.shape == (B, out_ch, Hh, Ww), y_bf16.shape
    assert y_bf16.dtype == jnp.bfloat16
    assert jnp.allclose(y_bf16.astype(jnp.float32), y_ref,
                        atol=2e-2, rtol=2e-2), "bf16-out mismatch"

    # Odd spatial size + odd batch: exercises full-dim HW block and the
    # batch-block divisor logic.
    x2 = jax.random.normal(jax.random.PRNGKey(1), (3, in_ch, 9, 9),
                           dtype=jnp.float32)
    y2 = jax.block_until_ready(meta_net_pallas(x2, w1, b1, w2, b2))
    y2_ref = _reference(x2, w1, b1, w2, b2)
    assert jnp.allclose(y2, y2_ref, atol=1e-5, rtol=1e-5), "odd-shape mismatch"

    print("KERNEL_OK")
</pallas_src>

<mosaic_0001>
module attributes {stable_mosaic.version = 11 : i64} {
  func.func @_meta_net_kernel(%arg0: i32, %arg1: i32, %arg2: memref<1x4x256xf32, #tpu.memory_space<vmem>>, %arg3: memref<4x4xf32, #tpu.memory_space<vmem>>, %arg4: memref<4x1xf32, #tpu.memory_space<vmem>>, %arg5: memref<8x4xf32, #tpu.memory_space<vmem>>, %arg6: memref<8x1xf32, #tpu.memory_space<vmem>>, %arg7: memref<1x8x256xf32, #tpu.memory_space<vmem>>) attributes {dimension_semantics = [#tpu.dimension_semantics<parallel>, #tpu.dimension_semantics<parallel>], iteration_bounds = array<i64: 2, 1>, scalar_prefetch = 0 : i64, scratch_operands = 0 : i64, tpu.core_type = #tpu.core_type<tc>, window_params = [{transform_indices = @transform_0, window_bounds = array<i64: 1, 4, 256>}, {pipeline_mode = #tpu.pipeline_mode<synchronous>, transform_indices = @transform_1, window_bounds = array<i64: 4, 4>}, {pipeline_mode = #tpu.pipeline_mode<synchronous>, transform_indices = @transform_2, window_bounds = array<i64: 4, 1>}, {pipeline_mode = #tpu.pipeline_mode<synchronous>, transform_indices = @transform_3, window_bounds = array<i64: 8, 4>}, {pipeline_mode = #tpu.pipeline_mode<synchronous>, transform_indices = @transform_4, window_bounds = array<i64: 8, 1>}, {transform_indices = @transform_5, window_bounds = array<i64: 1, 8, 256>}]} {
    %c0 = arith.constant 0 : index
    %c0_0 = arith.constant 0 : index
    %c0_1 = arith.constant 0 : index
    %0 = vector.load %arg2[%c0, %c0_0, %c0_1] : memref<1x4x256xf32, #tpu.memory_space<vmem>>, vector<1x4x256xf32>
    %c0_2 = arith.constant 0 : index
    %c0_3 = arith.constant 0 : index
    %1 = vector.load %arg3[%c0_2, %c0_3] : memref<4x4xf32, #tpu.memory_space<vmem>>, vector<4x4xf32>
    %2 = vector.shape_cast %1 : vector<4x4xf32> to vector<1x4x4xf32>
    %c0_4 = arith.constant 0 : index
    %c0_5 = arith.constant 0 : index
    %3 = vector.load %arg5[%c0_4, %c0_5] : memref<8x4xf32, #tpu.memory_space<vmem>>, vector<8x4xf32>
    %4 = vector.shape_cast %3 : vector<8x4xf32> to vector<1x8x4xf32>
    "tpu.trace_start"() <{level = 10 : i32, message = "boi,bil->bol"}> : () -> ()
    %cst = arith.constant dense<0.000000e+00> : vector<1x4x256xf32>
    %5 = tpu.matmul %2, %0, %cst {dimension_numbers = #tpu.dot_dimension_numbers<[2], [1], [1], [2], [0, 0, 0, 1, 1, 2], [0], [0]>} : vector<1x4x4xf32>, vector<1x4x256xf32>, vector<1x4x256xf32> -> vector<1x4x256xf32>
    "tpu.trace_stop"() : () -> ()
    %c0_6 = arith.constant 0 : index
    %c0_7 = arith.constant 0 : index
    %6 = vector.load %arg4[%c0_6, %c0_7] : memref<4x1xf32, #tpu.memory_space<vmem>>, vector<4x1xf32>
    %7 = vector.shape_cast %6 : vector<4x1xf32> to vector<1x4x1xf32>
    %8 = vector.broadcast %7 : vector<1x4x1xf32> to vector<1x4x256xf32>
    %9 = arith.addf %5, %8 : vector<1x4x256xf32>
    %cst_8 = arith.constant 0.000000e+00 : f32
    %10 = vector.broadcast %cst_8 : f32 to vector<1x4x256xf32>
    %11 = arith.maximumf %9, %10 : vector<1x4x256xf32>
    "tpu.trace_start"() <{level = 10 : i32, message = "boi,bil->bol"}> : () -> ()
    %cst_9 = arith.constant dense<0.000000e+00> : vector<1x8x256xf32>
    %12 = tpu.matmul %4, %11, %cst_9 {dimension_numbers = #tpu.dot_dimension_numbers<[2], [1], [1], [2], [0, 0, 0, 1, 1, 2], [0], [0]>} : vector<1x8x4xf32>, vector<1x4x256xf32>, vector<1x8x256xf32> -> vector<1x8x256xf32>
    "tpu.trace_stop"() : () -> ()
    %c0_10 = arith.constant 0 : index
    %c0_11 = arith.constant 0 : index
    %13 = vector.load %arg6[%c0_10, %c0_11] : memref<8x1xf32, #tpu.memory_space<vmem>>, vector<8x1xf32>
    %14 = vector.shape_cast %13 : vector<8x1xf32> to vector<1x8x1xf32>
    %15 = vector.broadcast %14 : vector<1x8x1xf32> to vector<1x8x256xf32>
    %16 = arith.addf %12, %15 : vector<1x8x256xf32>
    %c0_12 = arith.constant 0 : index
    %c0_13 = arith.constant 0 : index
    %c0_14 = arith.constant 0 : index
    %17 = vector.load %arg7[%c0_12, %c0_13, %c0_14] : memref<1x8x256xf32, #tpu.memory_space<vmem>>, vector<1x8x256xf32>
    tpu.vector_store %arg7[%c0_12, %c0_13, %c0_14], %16 {strides = array<i32>} : memref<1x8x256xf32, #tpu.memory_space<vmem>>, vector<1x8x256xf32>,
    return
  }
  func.func @transform_0(%arg0: i32, %arg1: i32) -> (i32, i32, i32) {
    %c0_i32 = arith.constant 0 : i32
    %c0_i32_0 = arith.constant 0 : i32
    return %arg0, %c0_i32, %arg1 : i32, i32, i32
  }
  func.func @transform_1(%arg0: i32, %arg1: i32) -> (i32, i32) {
    %c0_i32 = arith.constant 0 : i32
    %c0_i32_0 = arith.constant 0 : i32
    %c0_i32_1 = arith.constant 0 : i32
    return %c0_i32, %c0_i32_0 : i32, i32
  }
  func.func @transform_2(%arg0: i32, %arg1: i32) -> (i32, i32) {
    %c0_i32 = arith.constant 0 : i32
    %c0_i32_0 = arith.constant 0 : i32
    %c0_i32_1 = arith.constant 0 : i32
    return %c0_i32, %c0_i32_0 : i32, i32
  }
  func.func @transform_3(%arg0: i32, %arg1: i32) -> (i32, i32) {
    %c0_i32 = arith.constant 0 : i32
    %c0_i32_0 = arith.constant 0 : i32
    %c0_i32_1 = arith.constant 0 : i32
    return %c0_i32, %c0_i32_0 : i32, i32
  }
  func.func @transform_4(%arg0: i32, %arg1: i32) -> (i32, i32) {
    %c0_i32 = arith.constant 0 : i32
    %c0_i32_0 = arith.constant 0 : i32
    %c0_i32_1 = arith.constant 0 : i32
    return %c0_i32, %c0_i32_0 : i32, i32
  }
  func.func @transform_5(%arg0: i32, %arg1: i32) -> (i32, i32, i32) {
    %c0_i32 = arith.constant 0 : i32
    %c0_i32_0 = arith.constant 0 : i32
    return %arg0, %c0_i32, %arg1 : i32, i32, i32
  }
}

</mosaic_0001>

<bundles_post_ra>
// kernel: tpu_custom_call.1
= control target key start
LH: loop header
LB: loop body
LE: loop exit
PB: predicated region body
PF: predicated region fallthrough
CT: control target
= control target key end

     0   :  { %10 = vsyncpa [#allocation3], 0  ;;  %s849_s0 = inlined_call_operand.vmem [shape: f32[2,4,256], index: 0, kind: input, shape index: {}]   ;;  %s850_s1 = inlined_call_operand.vmem [shape: f32[4,4], index: 1, kind: input, shape index: {}]   ;;  %s851_s2 = inlined_call_operand.vmem [shape: f32[4,1], index: 2, kind: input, shape index: {}]   ;;  %s852_s3 = inlined_call_operand.vmem [shape: f32[8,4], index: 3, kind: input, shape index: {}]   ;;  %s853_s4 = inlined_call_operand.vmem [shape: f32[8,1], index: 4, kind: input, shape index: {}]   ;;  %s854_s5 = inlined_call_operand.hbm [shape: f32[2,8,256], index: 5, kind: output, shape index: {}]  }
   0x1   :  { %12 = vsyncpa [#allocation3 + $0x1], 0  ;;  %s721_s18 = smov 0   ;;  %s723_s19 = smov 0  }
   0x2   :  { %s725_s20 = smov 0   ;;  %s727_s21 = smov 0  }
   0x3   :  { %s729_s22 = smov 0   ;;  %s731_s23 = smov 0  }
   0x4 LB: > { %s528_s24 = sadd.s32 4294967295, %s686_s23   ;;  %s529_s25 = sadd.s32 4294967294, %s686_s23   ;;  %s686_s23 = sphi %s731_s23, %s18_s23   ;;  %s682_s22 = sphi %s729_s22, %s861_s22   ;;  %s678_s21 = sphi %s727_s21, %s860_s21   ;;  %s674_s20 = sphi %s725_s20, %s859_s20   ;;  %s670_s19 = sphi %s723_s19, %s858_s19   ;;  %s666_s18 = sphi %s721_s18, %s857_s18  }
   0x5   : > { %s30_s26 = sadd.s32 1, %s682_s22  ;;  %s151_s27 = sadd.s32 1, %s674_s20 }
   0x6   : > { %p32_p0 = scmp.ge.s32.totalorder %s30_s26, 2  ;;  %p161_p1 = scmp.ne.s32.totalorder %s674_s20, %s670_s19 }
   0x7   : > { %p162_p2 = scmp.eq.s32.totalorder %s528_s24, 1  ;;  %p167_p3 = scmp.ne.s32.totalorder %s670_s19, %s666_s18 }
   0x8   : > { %s863_s26 = smov (%p32_p0, %s30_s26), 0  ;;  %p168_p5 = scmp.eq.s32.totalorder %s529_s25, 1 }
   0x9   : > { %p761_p4 = por %p162_p2, %p161_p1  ;;  %s146_s29 = ssub.s32 %s682_s22, %s863_s26 }
   0xa   : > { %p532_p6 = scmp.ge.s32.totalorder %s686_s23, 1  ;;  %p149_p7 = scmp.eq.s32.totalorder %s146_s29, 0 }
   0xb   : > { %p768_p8 = por %p168_p5, %p167_p3  ;;  %p211_p9 = scmp.lt.s32.totalorder %s686_s23, 3 }
   0xc   : > { %s774_s6 = scalar_select %p149_p7, %s674_s20, %s151_s27  }
   0xd   : > { %p212_p10 = pnand %p532_p6, %p211_p9 }
   0xe   : > { %p244_p11 = scmp.lt.s32.totalorder (!%p212_p10), %s678_s21, 1  ;;  %v688_v0 = vmov (!%p212_p10), 0.0   ;;  %v257_v1 = vld [vmem:[%s851_s2] sm:$0xf] (!%p212_p10)  ;;  %v689_v2 = vmov (!%p212_p10), 0   ;;  %vm269_vm0 = vcmask (!%p212_p10), 1043456  }
   0xf   : > { %215 = sbr.rel (%p212_p10) target bundleno = 479 (0x1df), region = 40  ;;  %338 = vmatprep.mubr.f32.mxu0 (!%p212_p10), %v688_v0  ;;  %426 = vmatprep.mubr.f32.mxu1 (!%p212_p10), %v688_v0  ;;  %v347_v3 = vld [vmem:[%s853_s4] sm:$0xff] (!%p212_p10)  ;;  %vm265_vm1 = vcmask (!%p212_p10), 31744   ;;  %s240_s27 = sand.u32 (!%p212_p10), 1, %s670_s19  }
  0x10   : > { %606 = vset.pattern.permute.xlu0 (!%p212_p10), %v689_v2  ;;  %v255_v6 = vld [vmem:[%s850_s1] sm:$0xf] (!%p212_p10)  ;;  %s533_s29 = sshll.u32 (!%p212_p10), %s240_s27, 4  ;;  %s548_s7 = sshll.u32 (!%p212_p10), %s678_s21, 8 }
  0x11   : > { %260 = vperm.xlu0 (!%p212_p10), %606, %v257_v1   ;;  %v256_v14 = vld [vmem:[%s852_s3] sm:$0xff] (!%p212_p10)  ;;  %s242_s8 = scalar_lea.vmem (!%p212_p10), [#allocation2], %s533_s29  ;;  %s802_s12 = scalar_lea.hbm (!%p212_p10), %s854_s5, %s548_s7 }
  0x12   : > { %s690_s14 = smov (!%p212_p10), [#allocation2]  }
  0x15   : > { %350 = vperm.xlu0 (!%p212_p10), %606, %v347_v3  }
  0x16   : > { %s245_s9 = scalar_select %p244_p11, %s678_s21, 1 }
  0x17   : > { %s436_s21 = scalar_lea.sflag [#allocation3], %s240_s27 }
  0x18   : > { %s547_s10 = sshll.u32 %s245_s9, 3  ;;  %s452_s9 = sshll.u32 %s242_s8, 4  ;;  %s804_s9 = int_to_ptr.vmem [resolvable:$true] %s452_s9 }
  0x19   : > { %s251_s15 = scalar_lea.vmem %s849_s0, %s547_s10  ;;  %s608_s13 = scalar_lea.vmem %s804_s9, 256 }
  0x1a   : > { %v254_v4 = vld [vmem:[%s251_s15] sm:$0xff]  ;;  %p609_p12 = scmp.ne.s32.totalorder %s804_s9, %s608_s13  ;;  %s612_s15 = sshll.u32 %s690_s14, 4  ;;  %s613_s15 = int_to_ptr.vmem [resolvable:$false] %s612_s15 }
  0x1b   : > { %v264_v5 = vcombine.high %v254_v4, %v254_v4  ;;  %s614_s16 = scalar_lea.vmem %s613_s15, 512  ;;  %p615_p1 = scmp.lt.s32.totalorder %s804_s9, %s613_s15 }
  0x1c   : > { %p610_p13 = pnand %p609_p12, %p761_p4  ;;  %p616_p2 = scmp.lt.s32.totalorder %s614_s16, %s608_s13 }
  0x1d   : > { %536 = vmatprep.subr.msk.mxu0 %vm269_vm0, %v264_v5 }
  0x1e   : > { %537 = vmatpush1.msk.msra.mxu0 %vm269_vm0, %v254_v4  ;;  %p611_p0 = pneg %p610_p13  ;;  %p617_p3 = por %p616_p2, %p615_p1 }
  0x1f   : > { %538 = vmatmul.mubr.msk.f32.vlgmr.msra.gmra.mrb[0].mxu0 %vm265_vm1, %v255_v6 }
  0x20   : > { %p618_p5 = pnand %p617_p3, %p611_p0 }
  0x90   : > { %v261_v7 = vpop.permute.xlu0 %260 }
  0x94   : > { %v351_v15 = vpop.permute.xlu0 %350 }
  0xf2   : > { %v340_v8 = vpop.f32.mrb[0].mxu0 }
  0xf3   : > { %v341_v9 = vadd.f32 %v340_v8, %v261_v7  ;;  %v342_v10 = vpop.f32.mrb[1].mxu0 }
  0xf4   : > { %v343_v11 = vadd.f32 %v342_v10, %v261_v7 }
  0xf5   : > { %v345_v13 = vmax.f32 %v341_v9, 0.0 }
  0xf6   : > { %v346_v12 = vmax.f32 %v343_v11, 0.0 }
  0xf8   : > { %539 = vmatprep.subr.msk.mxu1 %vm269_vm0, %v346_v12 }
  0xf9   : > { %540 = vmatpush1.msk.msra.mxu1 %vm269_vm0, %v345_v13 }
  0xfa   : > { %541 = vmatmul.mubr.msk.f32.vlgmr.msra.gmra.mrb[0].mxu1 %vm265_vm1, %v256_v14 }
 0x1cd   : > { %v428_v16 = vpop.f32.mrb[0].mxu1 }
 0x1ce   : > { %v429_v17 = vadd.f32 %v428_v16, %v351_v15  ;;  %v430_v18 = vpop.f32.mrb[1].mxu1 }
 0x1cf   : > { %v431_v19 = vadd.f32 %v430_v18, %v351_v15 }
 0x1d0   : > { %433 = vst [vmem:[%s242_s8] sm:$0xff] %v429_v17 }
 0x1d1   : > { %434 = vst [vmem:[%s242_s8 + $0x8] sm:$0xff] %v431_v19 }
 0x1d2   : > { %621 = shalt.err (!%p618_p5)
}
 0x1d3   : > { %s622_s17 = scalar_lea.hbm %s802_s12, 256  ;;  %s626_s27 = scalar_lea.hbm %s854_s5, 512 }
 0x1d4   : > { %p623_p6 = scmp.ne.s32.totalorder %s802_s12, %s622_s17  ;;  %p627_p10 = scmp.lt.u32.totalorder %s802_s12, %s854_s5 }
 0x1d5   : > { %p628_p11 = scmp.lt.u32.totalorder %s626_s27, %s622_s17  ;;  %p630_p13 = scmp.lt.u32.totalorder %s622_s17, %s802_s12 }
 0x1d6   : > { %p624_p7 = pnand %p623_p6, %p761_p4 }
 0x1d7   : > { %p629_p12 = por %p628_p11, %p627_p10 }
 0x1d8   : > { %p625_p9 = pneg %p624_p7 }
 0x1d9   : > { %p631_p0 = por %p630_p13, %p629_p12 }
 0x1db   : > { %p632_p1 = pnand %p631_p0, %p625_p9 }
 0x1dd   : > { %635 = shalt.err (!%p632_p1)
}
 0x1de   : > { %549 = dma.vmem_to_hbm [thread:$0]  (%p761_p4), %s804_s9, 256, %s802_s12, %s436_s21  }
 0x1df PF: > { %p555_p2 = scmp.ge.s32.totalorder %s686_s23, 2  ;;  %s464_s8 = sand.u32 1, %s666_s18  }
 0x1e0   : > { %s465_s10 = scalar_lea.sflag [#allocation3], %s464_s8 }
 0x1e1   : > { %p552_p3 = pnand %p555_p2, %p768_p8 }
 0x1e3   : > { %661 = dma.done.wait (!%p552_p3), %s465_s10, 256  }
 0x1e4   : > { %663 = vsyncadd (!%p552_p3), %s465_s10, 4294967040  ;;  %s18_s23 = sadd.s32 1, %s686_s23   ;;  %s857_s18 = smov %s670_s19 }
 0x1e5   : > { %p15_p5 = scmp.ge.s32.totalorder %s18_s23, 4   ;;  %s858_s19 = smov %s674_s20 }
 0x1e6   : > { %s859_s20 = smov %s774_s6  ;;  %s860_s21 = smov %s682_s22 }
 0x1e7   : > { %s861_s22 = smov %s863_s26  ;;  %17 = sbr.rel (!%p15_p5) target bundleno = 4 (0x4), region = 75 }
 0x1ee   :  { %470 = vsyncpa [#allocation3], 1 }
 0x1ef   :  { %472 = vsyncpa [#allocation3 + $0x1], 1 }

</bundles_post_ra>
